<compile_context>
chip_gen: v5e
topology: v5e:2x2
jax: 0.10.0
libtpu: 0.0.40
codegen_flags: <defaults>
</compile_context>

<pallas_src>
import jax
import jax.numpy as jnp
from jax.experimental import pallas as pl
from jax.experimental.pallas import tpu as pltpu


# ---------------------------------------------------------------------------
# Kernel
# ---------------------------------------------------------------------------
def mlp_kernel(x_ref, w1t_ref, b1_ref, w2t_ref, b2_ref, o_ref):
    # x_ref:   [TB, K]  streamed batch tile (f32 or bf16)
    # w1t_ref: [K, K]   bf16, [in, out] layout (pre-transposed in wrapper), resident
    # b1_ref:  [1, K]   f32
    # w2t_ref: [K, N]   bf16, [in, out] layout, resident
    # b2_ref:  [1, N]   f32
    # o_ref:   [TB, N]  lane-dense (N is a multiple of 128)
    x = x_ref[...].astype(jnp.bfloat16)
    h = jnp.dot(x, w1t_ref[...], preferred_element_type=jnp.float32)
    h = jnp.maximum(h + b1_ref[...], 0.0)                      # bias + ReLU (f32)
    y = jnp.dot(h.astype(jnp.bfloat16), w2t_ref[...],
                preferred_element_type=jnp.float32)
    o_ref[...] = jax.nn.sigmoid(y + b2_ref[...]).astype(o_ref.dtype)


# ---------------------------------------------------------------------------
# Helpers
# ---------------------------------------------------------------------------
def _round_up(v, m):
    return ((v + m - 1) // m) * m


def _vmem_budget():
    try:
        cap = int(pltpu.get_tpu_info().vmem_capacity_bytes)
    except Exception:
        cap = 64 * 1024 * 1024  # conservative fallback = v7x per-TC VMEM
    return min(int(cap * 0.75), 112 * 1024 * 1024)


def _divisors(n):
    out = set()
    i = 1
    while i * i <= n:
        if n % i == 0:
            out.add(i)
            out.add(n // i)
        i += 1
    return out


def _pick_tile_b(B, cap):
    """Largest 8-aligned divisor of B within the VMEM-derived cap, preferring
    >= 4 grid steps (keeps both v7x TensorCores pipelined)."""
    cap = max(8, min(cap, B, 4096))
    divs = _divisors(B)
    for min_steps in (4, 2, 1):
        cands = [d for d in divs
                 if d <= cap and B // d >= min_steps and (d % 8 == 0 or d == B)]
        if cands:
            return max(cands)
    cands = [d for d in divs if d <= cap]
    return max(cands) if cands else B


_BUFFERED1_OK = None


def _buffered1_supported():
    """One-time feature probe for pipeline_mode=pl.Buffered(1) (single-buffered
    grid-invariant operands).  Avoids a broad try/except around the real call."""
    global _BUFFERED1_OK
    if _BUFFERED1_OK is None:
        try:
            spec = pl.BlockSpec((8, 128), lambda i: (0, 0),
                                pipeline_mode=pl.Buffered(1))

            def _probe(x_ref, o_ref):
                o_ref[...] = x_ref[...] + 1.0

            out = pl.pallas_call(
                _probe,
                out_shape=jax.ShapeDtypeStruct((8, 128), jnp.float32),
                grid_spec=pltpu.PrefetchScalarGridSpec(
                    num_scalar_prefetch=0,
                    grid=(1,),
                    in_specs=[spec],
                    out_specs=pl.BlockSpec((8, 128), lambda i: (0, 0)),
                ),
            )(jnp.zeros((8, 128), jnp.float32))
            jax.block_until_ready(out)
            _BUFFERED1_OK = True
        except Exception:
            _BUFFERED1_OK = False
    return _BUFFERED1_OK


# ---------------------------------------------------------------------------
# Parameter preparation (one-time: bf16 cast, transpose, lane padding)
# ---------------------------------------------------------------------------
def prepare_mlp_params(w1, b1, w2, b2, *, weight_dtype=jnp.bfloat16):
    """w1: [D_in, D_in], w2: [D_out, D_in] in PyTorch (out, in) layout."""
    D_in = int(w1.shape[1])
    D_out = int(w2.shape[0])
    assert w1.shape == (D_in, D_in) and w2.shape == (D_out, D_in)
    K = _round_up(D_in, 128)
    N = _round_up(D_out, 128)
    w1t = jnp.pad(jnp.asarray(w1, weight_dtype).T, ((0, K - D_in), (0, K - D_in)))
    b1p = jnp.pad(jnp.asarray(b1, jnp.float32), (0, K - D_in)).reshape(1, K)
    w2t = jnp.pad(jnp.asarray(w2, weight_dtype).T, ((0, K - D_in), (0, N - D_out)))
    b2p = jnp.pad(jnp.asarray(b2, jnp.float32), (0, N - D_out)).reshape(1, N)
    return {"w1t": w1t, "b1": b1p, "w2t": w2t, "b2": b2p,
            "d_in": D_in, "d_out": D_out}


# ---------------------------------------------------------------------------
# pallas_call construction
# ---------------------------------------------------------------------------
def _make_mlp_call(B, K, N, tile_b, x_dtype, out_dtype, single_buffer_weights,
                   vmem_limit):
    grid = (B // tile_b,)
    wkw = dict(pipeline_mode=pl.Buffered(1)) if single_buffer_weights else {}

    in_specs = [
        pl.BlockSpec((tile_b, K), lambda i: (i, 0)),           # x tile (pipelined)
        pl.BlockSpec((K, K), lambda i: (0, 0), **wkw),         # W1^T, resident
        pl.BlockSpec((1, K), lambda i: (0, 0), **wkw),         # b1
        pl.BlockSpec((K, N), lambda i: (0, 0), **wkw),         # W2^T, resident
        pl.BlockSpec((1, N), lambda i: (0, 0), **wkw),         # b2
    ]

    cost = pl.CostEstimate(
        flops=2 * B * K * (K + N),
        transcendentals=B * N,
        bytes_accessed=B * K * jnp.dtype(x_dtype).itemsize
        + B * N * jnp.dtype(out_dtype).itemsize
        + (K * K + K * N) * 2          # bf16 weights
        + (K + N) * 4,                 # f32 biases
    )

    return pl.pallas_call(
        mlp_kernel,
        out_shape=jax.ShapeDtypeStruct((B, N), out_dtype),
        grid_spec=pltpu.PrefetchScalarGridSpec(
            num_scalar_prefetch=0,
            grid=grid,
            in_specs=in_specs,
            out_specs=pl.BlockSpec((tile_b, N), lambda i: (i, 0)),
        ),
        compiler_params=pltpu.CompilerParams(
            dimension_semantics=("parallel",),
            vmem_limit_bytes=int(vmem_limit),
        ),
        cost_estimate=cost,
    )


def _mlp_jnp(x_pad, p):
    # Fused XLA fallback for tiny problems (same bf16/f32 numerics as kernel).
    h = jnp.dot(x_pad.astype(jnp.bfloat16), p["w1t"],
                preferred_element_type=jnp.float32) + p["b1"]
    h = jnp.maximum(h, 0.0)
    y = jnp.dot(h.astype(jnp.bfloat16), p["w2t"],
                preferred_element_type=jnp.float32) + p["b2"]
    return jax.nn.sigmoid(y)


# ---------------------------------------------------------------------------
# Public forward
# ---------------------------------------------------------------------------
def mlp_forward_prepared(x, params, *, use_pallas=None, tile_b=None):
    B, d_in = x.shape
    assert d_in == params["d_in"]
    K = params["w1t"].shape[0]
    N = params["w2t"].shape[1]
    D_out = params["d_out"]

    if d_in != K:                                   # lane-align the contraction dim
        x = jnp.pad(x, ((0, 0), (0, K - d_in)))

    if use_pallas is None:
        # Tiny problems are launch/step-overhead bound -> plain XLA fusion wins.
        use_pallas = (B >= 512) and (K >= 128)

    if not use_pallas:
        y = _mlp_jnp(x, params)
        return y[:, :D_out] if N != D_out else y

    out_dtype = x.dtype
    vmem_budget = _vmem_budget()
    single_buf = _buffered1_supported()
    wbuf = 1 if single_buf else 2
    weight_bytes = ((K * K + K * N) * 2 + (K + N) * 4) * wbuf
    # TODO(synk): K-tile W1 with an f32 accumulator when weights exceed the budget.
    assert weight_bytes < vmem_budget, "resident bf16 weights exceed VMEM budget"

    row_bytes = (K * jnp.dtype(x.dtype).itemsize * 2
                 + N * jnp.dtype(out_dtype).itemsize * 2)
    cap = max(8, (vmem_budget - weight_bytes) // row_bytes)
    if tile_b is None:
        tile_b = _pick_tile_b(B, cap)
    assert B % tile_b == 0

    call = _make_mlp_call(B, K, N, tile_b, x.dtype, out_dtype, single_buf,
                          vmem_budget)
    y = call(x, params["w1t"], params["b1"], params["w2t"], params["b2"])
    return y[:, :D_out] if N != D_out else y


def mlp_forward(x, w1, b1, w2, b2, *, use_pallas=None, tile_b=None):
    """x: [B, D_in]; w1: [D_in, D_in]; b1: [D_in]; w2: [D_out, D_in]; b2: [D_out]
    (PyTorch (out, in) layout).  Dropout is identity (eval mode)."""
    params = prepare_mlp_params(w1, b1, w2, b2)
    return mlp_forward_prepared(x, params, use_pallas=use_pallas, tile_b=tile_b)


# ---------------------------------------------------------------------------
# Test harness
# ---------------------------------------------------------------------------
def _init_linear(key, out_features, in_features):
    # PyTorch nn.Linear default init: U(-1/sqrt(fan_in), 1/sqrt(fan_in))
    kw, kb = jax.random.split(key)
    bound = 1.0 / jnp.sqrt(in_features)
    w = jax.random.uniform(kw, (out_features, in_features), jnp.float32, -bound, bound)
    b = jax.random.uniform(kb, (out_features,), jnp.float32, -bound, bound)
    return w, b


if __name__ == "__main__":
    key = jax.random.PRNGKey(0)
    k_x, k_x2, k_l1, k_l2 = jax.random.split(key, 4)

    batch, input_size, output_size = 8, 32, 16

    x = jax.random.normal(k_x, (batch, input_size), jnp.float32)
    w1, b1 = _init_linear(k_l1, input_size, input_size)
    w2, b2 = _init_linear(k_l2, output_size, input_size)

    def ref_fn(xx):
        return jax.nn.sigmoid(jnp.maximum(xx @ w1.T + b1, 0.0) @ w2.T + b2)

    # Small batch: single-grid-step Pallas path (forced; the auto-gate would
    # route this tiny shape to the XLA fusion instead).
    out = jax.block_until_ready(mlp_forward(x, w1, b1, w2, b2, use_pallas=True))
    ref = ref_fn(x)
    assert out.shape == (batch, output_size)
    # bf16 matmul inputs + f32 accumulate -> loosened tolerance vs f32 reference.
    assert jnp.allclose(out, ref, atol=2e-2, rtol=2e-2), float(
        jnp.max(jnp.abs(out - ref)))

    # Larger batch: multi-step pipelined grid via the prepared-params path.
    params = prepare_mlp_params(w1, b1, w2, b2)
    B2 = 256
    x2 = jax.random.normal(k_x2, (B2, input_size), jnp.float32)
    out2 = jax.block_until_ready(mlp_forward_prepared(x2, params, use_pallas=True))
    ref2 = ref_fn(x2)
    assert out2.shape == (B2, output_size)
    assert jnp.allclose(out2, ref2, atol=2e-2, rtol=2e-2), float(
        jnp.max(jnp.abs(out2 - ref2)))

    print("KERNEL_OK")
</pallas_src>

<mosaic_0001>
module attributes {stable_mosaic.version = 11 : i64} {
  func.func @_probe(%arg0: i32, %arg1: memref<8x128xf32, #tpu.memory_space<vmem>>, %arg2: memref<8x128xf32, #tpu.memory_space<vmem>>) attributes {dimension_semantics = [#tpu.dimension_semantics<arbitrary>], iteration_bounds = array<i64: 1>, scalar_prefetch = 0 : i64, scratch_operands = 0 : i64, tpu.core_type = #tpu.core_type<tc>, window_params = [{pipeline_mode = #tpu.pipeline_mode<synchronous>, transform_indices = @transform_0, window_bounds = array<i64: 8, 128>}, {pipeline_mode = #tpu.pipeline_mode<synchronous>, transform_indices = @transform_1, window_bounds = array<i64: 8, 128>}]} {
    %c0 = arith.constant 0 : index
    %c0_0 = arith.constant 0 : index
    %0 = vector.load %arg1[%c0, %c0_0] : memref<8x128xf32, #tpu.memory_space<vmem>>, vector<8x128xf32>
    %cst = arith.constant 1.000000e+00 : f32
    %1 = vector.broadcast %cst : f32 to vector<8x128xf32>
    %2 = arith.addf %0, %1 : vector<8x128xf32>
    %c0_1 = arith.constant 0 : index
    %c0_2 = arith.constant 0 : index
    %3 = vector.load %arg2[%c0_1, %c0_2] : memref<8x128xf32, #tpu.memory_space<vmem>>, vector<8x128xf32>
    tpu.vector_store %arg2[%c0_1, %c0_2], %2 {strides = array<i32>} : memref<8x128xf32, #tpu.memory_space<vmem>>, vector<8x128xf32>,
    return
  }
  func.func @transform_0(%arg0: i32) -> (i32, i32) {
    %c0_i32 = arith.constant 0 : i32
    %c0_i32_0 = arith.constant 0 : i32
    %c0_i32_1 = arith.constant 0 : i32
    return %c0_i32, %c0_i32_0 : i32, i32
  }
  func.func @transform_1(%arg0: i32) -> (i32, i32) {
    %c0_i32 = arith.constant 0 : i32
    %c0_i32_0 = arith.constant 0 : i32
    %c0_i32_1 = arith.constant 0 : i32
    return %c0_i32, %c0_i32_0 : i32, i32
  }
}

module attributes {stable_mosaic.version = 11 : i64} {
  func.func @mlp_kernel(%arg0: i32, %arg1: memref<8x128xf32, #tpu.memory_space<vmem>>, %arg2: memref<128x128xbf16, #tpu.memory_space<vmem>>, %arg3: memref<1x128xf32, #tpu.memory_space<vmem>>, %arg4: memref<128x128xbf16, #tpu.memory_space<vmem>>, %arg5: memref<1x128xf32, #tpu.memory_space<vmem>>, %arg6: memref<8x128xf32, #tpu.memory_space<vmem>>) attributes {dimension_semantics = [#tpu.dimension_semantics<parallel>], iteration_bounds = array<i64: 1>, scalar_prefetch = 0 : i64, scratch_operands = 0 : i64, tpu.core_type = #tpu.core_type<tc>, window_params = [{transform_indices = @transform_0, window_bounds = array<i64: 8, 128>}, {pipeline_mode = #tpu.pipeline_mode<synchronous>, transform_indices = @transform_1, window_bounds = array<i64: 128, 128>}, {pipeline_mode = #tpu.pipeline_mode<synchronous>, transform_indices = @transform_2, window_bounds = array<i64: 1, 128>}, {pipeline_mode = #tpu.pipeline_mode<synchronous>, transform_indices = @transform_3, window_bounds = array<i64: 128, 128>}, {pipeline_mode = #tpu.pipeline_mode<synchronous>, transform_indices = @transform_4, window_bounds = array<i64: 1, 128>}, {transform_indices = @transform_5, window_bounds = array<i64: 8, 128>}]} {
    %c0 = arith.constant 0 : index
    %c0_0 = arith.constant 0 : index
    %0 = vector.load %arg1[%c0, %c0_0] : memref<8x128xf32, #tpu.memory_space<vmem>>, vector<8x128xf32>
    %1 = arith.truncf %0 : vector<8x128xf32> to vector<8x128xbf16>
    %c0_1 = arith.constant 0 : index
    %c0_2 = arith.constant 0 : index
    %2 = vector.load %arg2[%c0_1, %c0_2] : memref<128x128xbf16, #tpu.memory_space<vmem>>, vector<128x128xbf16>
    %cst = arith.constant dense<0.000000e+00> : vector<8x128xf32>
    %3 = tpu.matmul %1, %2, %cst {dimension_numbers = #tpu.dot_dimension_numbers<[1], [0], [0], [1], [0, 0, 1, 1], [], []>} : vector<8x128xbf16>, vector<128x128xbf16>, vector<8x128xf32> -> vector<8x128xf32>
    %c0_3 = arith.constant 0 : index
    %c0_4 = arith.constant 0 : index
    %4 = vector.load %arg3[%c0_3, %c0_4] : memref<1x128xf32, #tpu.memory_space<vmem>>, vector<1x128xf32>
    %5 = vector.broadcast %4 : vector<1x128xf32> to vector<8x128xf32>
    %6 = arith.addf %3, %5 : vector<8x128xf32>
    %cst_5 = arith.constant 0.000000e+00 : f32
    %7 = vector.broadcast %cst_5 : f32 to vector<8x128xf32>
    %8 = arith.maximumf %6, %7 : vector<8x128xf32>
    %9 = arith.truncf %8 : vector<8x128xf32> to vector<8x128xbf16>
    %c0_6 = arith.constant 0 : index
    %c0_7 = arith.constant 0 : index
    %10 = vector.load %arg4[%c0_6, %c0_7] : memref<128x128xbf16, #tpu.memory_space<vmem>>, vector<128x128xbf16>
    %cst_8 = arith.constant dense<0.000000e+00> : vector<8x128xf32>
    %11 = tpu.matmul %9, %10, %cst_8 {dimension_numbers = #tpu.dot_dimension_numbers<[1], [0], [0], [1], [0, 0, 1, 1], [], []>} : vector<8x128xbf16>, vector<128x128xbf16>, vector<8x128xf32> -> vector<8x128xf32>
    %c0_9 = arith.constant 0 : index
    %c0_10 = arith.constant 0 : index
    %12 = vector.load %arg5[%c0_9, %c0_10] : memref<1x128xf32, #tpu.memory_space<vmem>>, vector<1x128xf32>
    %13 = vector.broadcast %12 : vector<1x128xf32> to vector<8x128xf32>
    %14 = arith.addf %11, %13 : vector<8x128xf32>
    %15 = arith.negf %14 : vector<8x128xf32>
    %16 = math.exp %15 : vector<8x128xf32>
    %cst_11 = arith.constant 1.000000e+00 : f32
    %17 = vector.broadcast %cst_11 : f32 to vector<8x128xf32>
    %18 = arith.addf %17, %16 : vector<8x128xf32>
    %19 = arith.divf %17, %18 : vector<8x128xf32>
    %c0_12 = arith.constant 0 : index
    %c0_13 = arith.constant 0 : index
    %20 = vector.load %arg6[%c0_12, %c0_13] : memref<8x128xf32, #tpu.memory_space<vmem>>, vector<8x128xf32>
    tpu.vector_store %arg6[%c0_12, %c0_13], %19 {strides = array<i32>} : memref<8x128xf32, #tpu.memory_space<vmem>>, vector<8x128xf32>,
    return
  }
  func.func @transform_0(%arg0: i32) -> (i32, i32) {
    %c0_i32 = arith.constant 0 : i32
    %c0_i32_0 = arith.constant 0 : i32
    return %arg0, %c0_i32 : i32, i32
  }
  func.func @transform_1(%arg0: i32) -> (i32, i32) {
    %c0_i32 = arith.constant 0 : i32
    %c0_i32_0 = arith.constant 0 : i32
    %c0_i32_1 = arith.constant 0 : i32
    return %c0_i32, %c0_i32_0 : i32, i32
  }
  func.func @transform_2(%arg0: i32) -> (i32, i32) {
    %c0_i32 = arith.constant 0 : i32
    %c0_i32_0 = arith.constant 0 : i32
    %c0_i32_1 = arith.constant 0 : i32
    return %c0_i32, %c0_i32_0 : i32, i32
  }
  func.func @transform_3(%arg0: i32) -> (i32, i32) {
    %c0_i32 = arith.constant 0 : i32
    %c0_i32_0 = arith.constant 0 : i32
    %c0_i32_1 = arith.constant 0 : i32
    return %c0_i32, %c0_i32_0 : i32, i32
  }
  func.func @transform_4(%arg0: i32) -> (i32, i32) {
    %c0_i32 = arith.constant 0 : i32
    %c0_i32_0 = arith.constant 0 : i32
    %c0_i32_1 = arith.constant 0 : i32
    return %c0_i32, %c0_i32_0 : i32, i32
  }
  func.func @transform_5(%arg0: i32) -> (i32, i32) {
    %c0_i32 = arith.constant 0 : i32
    %c0_i32_0 = arith.constant 0 : i32
    return %arg0, %c0_i32 : i32, i32
  }
}

</mosaic_0001>

<bundles_post_ra>
// kernel: tpu_custom_call.1
= control target key start
LH: loop header
LB: loop body
LE: loop exit
PB: predicated region body
PF: predicated region fallthrough
CT: control target
= control target key end

     0   :  { %6 = vsyncpa [#allocation3], 0  ;;  %s115_s0 = inlined_call_operand.hbm [shape: f32[8,128], index: 0, kind: input, shape index: {}]   ;;  %s116_s1 = inlined_call_operand.hbm [shape: f32[8,128], index: 1, kind: output, shape index: {}]  }
   0x1   :  { %7 = vsyncpa [#allocation4], 0  ;;  %s13_s8 = sshll.u32 %s115_s0, 4  ;;  %s97_s9 = smov [#allocation2]   ;;  %s14_s8 = int_to_ptr.hbm [resolvable:$true] %s13_s8 }
   0x2   :  { %s15_s10 = sshll.u32 %s97_s9, 4  ;;  %s16_s10 = int_to_ptr.vmem [resolvable:$true] %s15_s10 }
   0x3   :  { %18 = dma.hbm_to_vmem [thread:$0]  %s14_s8, 128, %s16_s10, [#allocation3]  }
   0x4   :  { %93 = dma.done.wait [#allocation3], 128  }
   0x5   :  { %94 = vsyncadd [#allocation3], 4294967168  ;;  %s98_s11 = smov [#allocation5]   ;;  %s33_s15 = sshll.u32 %s116_s1, 4  ;;  %v23_v0 = vld [vmem:[#allocation2] sm:$0xff]  ;;  %s34_s15 = int_to_ptr.hbm [resolvable:$true] %s33_s15 }
   0x6   :  { %s31_s12 = sshll.u32 %s98_s11, 4  ;;  %v24_v1 = vadd.f32 1.0, %v23_v0  ;;  %s32_s12 = int_to_ptr.vmem [resolvable:$true] %s31_s12 }
   0x8   :  { %25 = vst [vmem:[#allocation5] sm:$0xff] %v24_v1 }
   0x9   :  { %36 = dma.vmem_to_hbm [thread:$0]  %s32_s12, 128, %s34_s15, [#allocation4]  }
   0xa   :  { %95 = dma.done.wait [#allocation4], 128  }
   0xb   :  { %96 = vsyncadd [#allocation4], 4294967168 }
   0xc   :  { %41 = vsyncpa [#allocation3], 1 }
   0xd   :  { %42 = vsyncpa [#allocation4], 1 }

// kernel: tpu_custom_call.1
= control target key start
LH: loop header
LB: loop body
LE: loop exit
PB: predicated region body
PF: predicated region fallthrough
CT: control target
= control target key end

     0   :  { %10 = vsyncpa [#allocation3], 0  ;;  %s519_s0 = inlined_call_operand.hbm [shape: f32[8,128], index: 0, kind: input, shape index: {}]   ;;  %s520_s1 = inlined_call_operand.hbm [shape: bf16[128,128], index: 1, kind: input, shape index: {}]   ;;  %s521_s2 = inlined_call_operand.vmem [shape: f32[1,128], index: 2, kind: input, shape index: {}]   ;;  %s522_s3 = inlined_call_operand.hbm [shape: bf16[128,128], index: 3, kind: input, shape index: {}]   ;;  %s523_s4 = inlined_call_operand.vmem [shape: f32[1,128], index: 4, kind: input, shape index: {}]   ;;  %s524_s5 = inlined_call_operand.hbm [shape: f32[8,128], index: 5, kind: output, shape index: {}]  }
   0x1   :  { %11 = vsyncpa [#allocation6], 0  ;;  %s28_s20 = sshll.u32 %s520_s1, 4  ;;  %s29_s20 = int_to_ptr.hbm [resolvable:$true] %s28_s20 }
   0x2   :  { %12 = vsyncpa [#allocation4], 0  ;;  %s465_s21 = smov [#allocation5]   ;;  %s18_s25 = sshll.u32 %s519_s0, 4  ;;  %s19_s25 = int_to_ptr.hbm [resolvable:$true] %s18_s25 }
   0x3   :  { %s30_s22 = sshll.u32 %s465_s21, 4  ;;  %s466_s26 = smov 64   ;;  %s31_s22 = int_to_ptr.vmem [resolvable:$true] %s30_s22 }
   0x4   :  { %s467_s27 = smov 4   ;;  %s468_s28 = smov [#allocation2]  }
   0x5   :  { %36 = dma.hbm_to_vmem [thread:$0]  %s29_s20, 1024, %s31_s22, [#allocation6], %s466_s26, %s466_s26, %s467_s27  }
   0x6   :  { %s20_s29 = sshll.u32 %s468_s28, 4  ;;  %s43_s7 = sshll.u32 %s522_s3, 4  ;;  %s21_s29 = int_to_ptr.vmem [resolvable:$true] %s20_s29  ;;  %s44_s7 = int_to_ptr.hbm [resolvable:$true] %s43_s7 }
   0x7   :  { %23 = dma.hbm_to_vmem [thread:$0]  %s19_s25, 128, %s21_s29, [#allocation3]  }
   0x8   :  { %s469_s1 = smov [#allocation7]  }
   0x9   :  { %s45_s8 = sshll.u32 %s469_s1, 4  ;;  %s46_s8 = int_to_ptr.vmem [resolvable:$true] %s45_s8 }
   0xa   :  { %51 = dma.hbm_to_vmem [thread:$0]  %s44_s7, 1024, %s46_s8, [#allocation6], %s466_s26, %s466_s26, %s467_s27  }
   0xb   :  { %459 = dma.done.wait [#allocation3], 128  }
   0xc   :  { %460 = vsyncadd [#allocation3], 4294967168 }
   0xd   :  { %461 = dma.done.wait [#allocation6], 2048  }
   0xe   :  { %462 = vsyncadd [#allocation6], 4294965248  ;;  %v342_v0 = vld [vmem:[#allocation5 + $0x38] sm:$0xff]  ;;  %v341_v1 = vld [vmem:[#allocation5 + $0x30] sm:$0xff] }
   0xf   :  { %136 = vmatpush.bf16.msra.mxu0 %v342_v0  ;;  %v350_v2 = vld [vmem:[#allocation7 + $0x38] sm:$0xff]  ;;  %v349_v3 = vld [vmem:[#allocation7 + $0x30] sm:$0xff]  ;;  %v340_v4 = vld [vmem:[#allocation5 + $0x28] sm:$0xff] }
  0x10   :  { %219 = vmatpush.bf16.msra.mxu1 %v350_v2  ;;  %v348_v5 = vld [vmem:[#allocation7 + $0x28] sm:$0xff]  ;;  %v339_v6 = vld [vmem:[#allocation5 + $0x20] sm:$0xff]  ;;  %v338_v8 = vld [vmem:[#allocation5 + $0x18] sm:$0xff] }
  0x11   :  { %v347_v7 = vld [vmem:[#allocation7 + $0x20] sm:$0xff]  ;;  %v346_v9 = vld [vmem:[#allocation7 + $0x18] sm:$0xff]  ;;  %v337_v10 = vld [vmem:[#allocation5 + $0x10] sm:$0xff] }
  0x12   :  { %v345_v11 = vld [vmem:[#allocation7 + $0x10] sm:$0xff]  ;;  %v336_v12 = vld [vmem:[#allocation5 + $0x8] sm:$0xff]  ;;  %v335_v13 = vld [vmem:[#allocation5] sm:$0xff] }
  0x13   :  { %137 = vmatpush.bf16.msra.mxu0 %v341_v1  ;;  %v66_v14 = vld [vmem:[#allocation2] sm:$0xff]  ;;  %v344_v16 = vld [vmem:[#allocation7 + $0x8] sm:$0xff]  ;;  %v343_v17 = vld [vmem:[#allocation7] sm:$0xff] }
  0x14   :  { %220 = vmatpush.bf16.msra.mxu1 %v349_v3  ;;  %v67_v15 = vpack.c.bf16 %v66_v14, %v66_v14  ;;  %v357_v18 = vld [vmem:[%s521_s2] ss:$0 sm:$0xff]  ;;  %s470_s2 = smov [#allocation8]  }
  0x15   :  { %v358_v24 = vld [vmem:[%s523_s4] ss:$0 sm:$0xff]  ;;  %s257_s11 = sshll.u32 %s470_s2, 4  ;;  %s259_s4 = sshll.u32 %s524_s5, 4  ;;  %s258_s11 = int_to_ptr.vmem [resolvable:$true] %s257_s11  ;;  %s260_s4 = int_to_ptr.hbm [resolvable:$true] %s259_s4 }
  0x17   :  { %138 = vmatpush.bf16.msra.mxu0 %v340_v4 }
  0x18   :  { %221 = vmatpush.bf16.msra.mxu1 %v348_v5 }
  0x1b   :  { %139 = vmatpush.bf16.msra.mxu0 %v339_v6 }
  0x1c   :  { %222 = vmatpush.bf16.msra.mxu1 %v347_v7 }
  0x1f   :  { %140 = vmatpush.bf16.msra.mxu0 %v338_v8 }
  0x20   :  { %223 = vmatpush.bf16.msra.mxu1 %v346_v9 }
  0x23   :  { %141 = vmatpush.bf16.msra.mxu0 %v337_v10 }
  0x24   :  { %224 = vmatpush.bf16.msra.mxu1 %v345_v11 }
  0x27   :  { %142 = vmatpush.bf16.msra.mxu0 %v336_v12 }
  0x28   :  { %225 = vmatpush.bf16.msra.mxu1 %v344_v16 }
  0x2b   :  { %143 = vmatpush.bf16.msra.mxu0 %v335_v13 }
  0x2c   :  { %226 = vmatpush.bf16.msra.mxu1 %v343_v17 }
  0x2e   :  { %144 = vmatmul.bf16.vlgmr.msra.gmra.mxu0 %v67_v15 }
  0xab   :  { %v145_v19 = vpop.f32.mrf.mxu0 }
  0xac   :  { %v146_v20 = vadd.f32 %v357_v18, %v145_v19 }
  0xae   :  { %v149_v21 = vmax.f32 %v146_v20, 0.0 }
  0xb0   :  { %v150_v22 = vpack.c.bf16 %v149_v21, %v149_v21 }
  0xb2   :  { %227 = vmatmul.bf16.vlgmr.msra.gmra.mxu1 %v150_v22 }
  0xb3   :  { %v147_v23 = vpop.f32.mrf.mxu0 }
 0x12f   :  { %v228_v25 = vpop.f32.mrf.mxu1 }
 0x130   :  { %v229_v26 = vadd.f32 %v358_v24, %v228_v25 }
 0x132   :  { %v334_v27 = vmul.f32 -1.442695, %v229_v26 }
 0x134   :  { %359 = vpow2.f32 %v334_v27 }
 0x137   :  { %v230_v28 = vpop.f32.mrf.mxu1 }
 0x13a   :  { %v360_v29 = vpop.eup %359 }
 0x13b   :  { %v235_v30 = vadd.f32 1.0, %v360_v29 }
 0x13d   :  { %361 = vrcp.f32 %v235_v30  ;;  %v247_v34 = vand.u32 2147483648, %v235_v30  ;;  %v245_v36 = vand.u32 2147483647, %v235_v30  ;;  %vm241_vm1 = vweird.f32 %v235_v30 }
 0x13f   :  { %v248_v38 = vor.u32 1.1754944e-38, %v247_v34  ;;  %vm246_vm3 = vcmp.eq.f32.partialorder %v245_v36, 8.507059e+37 }
 0x143   :  { %v362_v31 = vpop.eup %361 }
 0x144   :  { %v237_v32 = vmul.f32 %v362_v31, %v235_v30  ;;  %vm242_vm0 = vweird.f32 %v362_v31 }
 0x145   :  { %vm243_vm2 = vmor %vm241_vm1, %vm242_vm0 }
 0x146   :  { %v238_v33 = vsub.f32 1.0, %v237_v32 }
 0x148   :  { %v239_v35 = vmul.f32 %v362_v31, %v238_v33 }
 0x14a   :  { %v240_v37 = vadd.f32 %v362_v31, %v239_v35 }
 0x14c   :  { %v244_v39 = vsel %vm243_vm2, %v362_v31, %v240_v37 }
 0x14d   :  { %v249_v40 = vsel %vm246_vm3, %v248_v38, %v244_v39 }
 0x14e   :  { %251 = vst [vmem:[#allocation8] sm:$0xff] %v249_v40 }
 0x14f   :  { %262 = dma.vmem_to_hbm [thread:$0]  %s258_s11, 128, %s260_s4, [#allocation4]  }
 0x150   :  { %463 = dma.done.wait [#allocation4], 128  }
 0x151   :  { %464 = vsyncadd [#allocation4], 4294967168 }
 0x152   :  { %267 = vsyncpa [#allocation3], 1 }
 0x153   :  { %268 = vsyncpa [#allocation6], 1 }
 0x154   :  { %269 = vsyncpa [#allocation4], 1 }

</bundles_post_ra>
